<compile_context>
chip_gen: v5e
topology: v5e:2x2
jax: 0.10.0
libtpu: 0.0.40
codegen_flags: <defaults>
</compile_context>

<pallas_src>
import functools

import jax
import jax.numpy as jnp
from jax.experimental import pallas as pl
from jax.experimental.pallas import tpu as pltpu


def _leaky_relu(x, slope=0.2):
    # max(x, slope*x) == LeakyReLU(slope) for 0 < slope < 1; one fewer VPU op
    # than compare+select.
    return jnp.maximum(x, slope * x)


def _compute_h2(x, w1, b1, w2):
    """x: (cin_p, TP); w1: (ndf, cin_p); b1: (ndf, 1); w2: (c2, ndf) -> (c2, TP)."""
    z1 = jnp.dot(w1, x, preferred_element_type=jnp.float32) + b1   # conv1 (MXU)
    h1 = _leaky_relu(z1)
    # conv2 (MXU).  TODO(synk): bf16 operands here on v6e/v7x for ~3x MXU rate.
    return jnp.dot(w2, h1, preferred_element_type=jnp.float32)


def _stats_kernel(x_ref, w1_ref, b1_ref, w2_ref, sum_ref, sumsq_ref,
                  *, tp, hw, need_mask):
    """Pass 1: lane-wide per-(batch, channel) sum / sum-of-squares of h2."""
    j = pl.program_id(1)

    @pl.when(j == 0)
    def _():
        sum_ref[...] = jnp.zeros_like(sum_ref)
        sumsq_ref[...] = jnp.zeros_like(sumsq_ref)

    h2 = _compute_h2(x_ref[0], w1_ref[...], b1_ref[...], w2_ref[...])  # (c2, tp)
    if need_mask:
        # Zero out padded pixels so they do not pollute BatchNorm statistics.
        pos = jax.lax.broadcasted_iota(jnp.int32, (1, tp), 1) + j * tp
        h2 = jnp.where(pos < hw, h2, 0.0)

    # Lane-wide (c2, 128) accumulation: elementwise adds over lane-aligned
    # slices only — no cross-lane XLU reduce and no lane-width-1 masked stores
    # in the hot loop; the final cross-lane reduction happens in JAX.
    groups = tp // 128
    s = h2[:, 0:128]
    ss = s * s
    for g in range(1, groups):
        blk = h2[:, g * 128:(g + 1) * 128]
        s = s + blk
        ss = ss + blk * blk
    sum_ref[0] += s
    sumsq_ref[0] += ss


def _apply_kernel(x_ref, w1_ref, b1_ref, w2_ref, scale_ref, shift_ref,
                  w3_ref, out_ref):
    """Pass 2: recompute h2, apply BN + LeakyReLU + conv3 (1 output channel)."""
    h2 = _compute_h2(x_ref[0], w1_ref[...], b1_ref[...], w2_ref[...])
    h3 = _leaky_relu(h2 * scale_ref[...] + shift_ref[...])
    # conv3 on the MXU: (1, c2) @ (c2, TP) — keeps the VALU slot free.
    out_ref[0] = jnp.dot(w3_ref[...], h3, preferred_element_type=jnp.float32)


def _resident_spec(shape):
    # Full-array block with a constant index_map: stays resident in VMEM.
    return pl.BlockSpec(shape, lambda i, j: (0,) * len(shape))


def pixel_discriminator(x_nchw, params, *, max_pixels_per_tile=8192, eps=1e-5):
    """x_nchw: (N, Cin, H, W) float32.  Returns (N, 1, H, W) float32."""
    w1, b1, w2, gamma, beta, w3 = params
    n, cin, h, w = x_nchw.shape
    hw = h * w
    m = n * hw
    ndf = w1.shape[0]
    c2 = w2.shape[0]

    # Pixel tile: a multiple of 128, as large as the cap allows (amortizes the
    # ~0.35 us/grid-step overhead).  The pixel axis is padded up to a multiple
    # of the tile so arbitrary H*W keeps the lane-dense pipelined path.
    cap = max(128, (max_pixels_per_tile // 128) * 128)
    hw128 = -(-hw // 128) * 128
    tp = min(cap, hw128)
    hw_p = -(-hw // tp) * tp
    num_t = hw_p // tp
    grid = (n, num_t)

    # Channel axis padded to a sublane multiple so conv1 lowers as a clean MXU
    # matmul (zero-padded channels contribute nothing).
    cin_p = -(-cin // 8) * 8

    # Free reshape (plus cheap zero padding when needed): channels on sublanes,
    # pixels on lanes.
    x3 = x_nchw.reshape(n, cin, hw)
    if cin_p != cin or hw_p != hw:
        x3 = jnp.pad(x3, ((0, 0), (0, cin_p - cin), (0, hw_p - hw)))

    w1p = w1 if cin_p == cin else jnp.pad(w1, ((0, 0), (0, cin_p - cin)))
    b1c = b1.reshape(ndf, 1)      # (ndf, 1)
    w3r = w3.reshape(1, c2)       # (1, c2)

    x_spec = pl.BlockSpec((1, cin_p, tp), lambda i, j: (i, 0, j))
    acc_spec = pl.BlockSpec((1, c2, 128), lambda i, j: (i, 0, 0))

    stats_params = pltpu.CompilerParams(
        # Per-batch private accumulators -> batch axis can be parallel (uses
        # both TCs on v7x); pixel-tile axis is the sequential reduction.
        dimension_semantics=("parallel", "arbitrary"),
        vmem_limit_bytes=32 * 1024 * 1024)
    apply_params = pltpu.CompilerParams(
        dimension_semantics=("parallel", "parallel"),
        vmem_limit_bytes=32 * 1024 * 1024)

    # ---- Pass 1: lane-wide per-(batch, channel) sums of h2 over valid pixels.
    ch_sum, ch_sumsq = pl.pallas_call(
        functools.partial(_stats_kernel, tp=tp, hw=hw, need_mask=hw_p != hw),
        out_shape=(jax.ShapeDtypeStruct((n, c2, 128), jnp.float32),
                   jax.ShapeDtypeStruct((n, c2, 128), jnp.float32)),
        grid=grid,
        in_specs=[
            x_spec,
            _resident_spec((ndf, cin_p)),
            _resident_spec((ndf, 1)),
            _resident_spec((c2, ndf)),
        ],
        out_specs=(acc_spec, acc_spec),
        compiler_params=stats_params,
    )(x3, w1p, b1c, w2)

    # ---- Fold BatchNorm statistics (a few thousand scalars) in plain JAX.
    mean = jnp.sum(ch_sum, axis=(0, 2)) / m
    var = jnp.maximum(jnp.sum(ch_sumsq, axis=(0, 2)) / m - mean * mean, 0.0)
    inv_std = jax.lax.rsqrt(var + eps)
    scale = (gamma * inv_std).reshape(c2, 1)
    shift = (beta - gamma * inv_std * mean).reshape(c2, 1)

    # ---- Pass 2: recompute h1/h2 per tile, apply BN + LeakyReLU + conv3.
    out = pl.pallas_call(
        _apply_kernel,
        out_shape=jax.ShapeDtypeStruct((n, 1, hw_p), jnp.float32),
        grid=grid,
        in_specs=[
            x_spec,
            _resident_spec((ndf, cin_p)),
            _resident_spec((ndf, 1)),
            _resident_spec((c2, ndf)),
            _resident_spec((c2, 1)),
            _resident_spec((c2, 1)),
            _resident_spec((1, c2)),
        ],
        out_specs=pl.BlockSpec((1, 1, tp), lambda i, j: (i, 0, j)),
        compiler_params=apply_params,
    )(x3, w1p, b1c, w2, scale, shift, w3r)

    return out[:, :, :hw].reshape(n, 1, h, w)


def init_params(key, input_nc, ndf):
    k1, k2, k3, kb = jax.random.split(key, 4)
    # Weights in the PyTorch conv orientation (out_channels, in_channels).
    w1 = jax.random.normal(k1, (ndf, input_nc), jnp.float32) / jnp.sqrt(input_nc)
    b1 = jax.random.normal(kb, (ndf,), jnp.float32) * 0.01
    w2 = jax.random.normal(k2, (2 * ndf, ndf), jnp.float32) / jnp.sqrt(ndf)
    gamma = jnp.ones((2 * ndf,), jnp.float32)    # BatchNorm affine init
    beta = jnp.zeros((2 * ndf,), jnp.float32)
    w3 = jax.random.normal(k3, (1, 2 * ndf), jnp.float32) / jnp.sqrt(2 * ndf)
    return (w1, b1, w2, gamma, beta, w3)


def reference_forward(x_nchw, params, eps=1e-5):
    """Pure-JAX reference mirroring the PyTorch semantics."""
    w1, b1, w2, gamma, beta, w3 = params
    n, cin, h, w = x_nchw.shape
    xf = jnp.transpose(x_nchw, (0, 2, 3, 1)).reshape(-1, cin)
    h1 = jnp.maximum(xf @ w1.T + b1[None, :], 0.2 * (xf @ w1.T + b1[None, :]))
    h2 = h1 @ w2.T
    mean = jnp.mean(h2, axis=0, keepdims=True)
    var = jnp.mean((h2 - mean) ** 2, axis=0, keepdims=True)
    h2n = (h2 - mean) * jax.lax.rsqrt(var + eps) * gamma[None, :] + beta[None, :]
    out = jnp.maximum(h2n, 0.2 * h2n) @ w3.T
    return jnp.transpose(out.reshape(n, h, w, 1), (0, 3, 1, 2))


if __name__ == "__main__":
    key = jax.random.PRNGKey(0)
    kx, kp, kx2 = jax.random.split(key, 3)

    N, Cin, H, W = 2, 4, 16, 16
    ndf = 64

    params = init_params(kp, Cin, ndf)
    x = jax.random.normal(kx, (N, Cin, H, W), jnp.float32)
    ref = jax.block_until_ready(reference_forward(x, params))

    # (a) tile=128 forces a multi-tile grid (2 x 2) so the cross-tile BatchNorm
    #     accumulation path is exercised even at this toy size.
    out_a = jax.block_until_ready(
        pixel_discriminator(x, params, max_pixels_per_tile=128))
    assert out_a.shape == (N, 1, H, W)
    assert jnp.allclose(out_a, ref, atol=1e-3, rtol=1e-3), (
        float(jnp.max(jnp.abs(out_a - ref))))

    # (b) default cap -> single 256-pixel tile, exercises the multi-group
    #     lane-wide accumulation loop.
    out_b = jax.block_until_ready(pixel_discriminator(x, params))
    assert jnp.allclose(out_b, ref, atol=1e-3, rtol=1e-3), (
        float(jnp.max(jnp.abs(out_b - ref))))

    # (c) non-128-multiple spatial size -> exercises the pad-and-mask path.
    x2 = jax.random.normal(kx2, (N, Cin, 10, 10), jnp.float32)
    ref2 = jax.block_until_ready(reference_forward(x2, params))
    out_c = jax.block_until_ready(pixel_discriminator(x2, params))
    assert out_c.shape == (N, 1, 10, 10)
    assert jnp.allclose(out_c, ref2, atol=1e-3, rtol=1e-3), (
        float(jnp.max(jnp.abs(out_c - ref2))))

    print("KERNEL_OK")
</pallas_src>

<mosaic_0001>
module attributes {stable_mosaic.version = 11 : i64} {
  func.func @_stats_kernel(%arg0: i32, %arg1: i32, %arg2: memref<1x8x128xf32, #tpu.memory_space<vmem>>, %arg3: memref<64x8xf32, #tpu.memory_space<vmem>>, %arg4: memref<64x1xf32, #tpu.memory_space<vmem>>, %arg5: memref<128x64xf32, #tpu.memory_space<vmem>>, %arg6: memref<1x128x128xf32, #tpu.memory_space<vmem>>, %arg7: memref<1x128x128xf32, #tpu.memory_space<vmem>>) attributes {dimension_semantics = [#tpu.dimension_semantics<parallel>, #tpu.dimension_semantics<arbitrary>], iteration_bounds = array<i64: 2, 2>, scalar_prefetch = 0 : i64, scratch_operands = 0 : i64, tpu.core_type = #tpu.core_type<tc>, window_params = [{transform_indices = @transform_0, window_bounds = array<i64: 1, 8, 128>}, {pipeline_mode = #tpu.pipeline_mode<synchronous>, transform_indices = @transform_1, window_bounds = array<i64: 64, 8>}, {pipeline_mode = #tpu.pipeline_mode<synchronous>, transform_indices = @transform_2, window_bounds = array<i64: 64, 1>}, {pipeline_mode = #tpu.pipeline_mode<synchronous>, transform_indices = @transform_3, window_bounds = array<i64: 128, 64>}, {transform_indices = @transform_4, window_bounds = array<i64: 1, 128, 128>}, {transform_indices = @transform_5, window_bounds = array<i64: 1, 128, 128>}]} {
    %c0_i32 = arith.constant 0 : i32
    %0 = arith.cmpi eq, %arg1, %c0_i32 : i32
    %1 = arith.extui %0 : i1 to i32
    %c0_i32_0 = arith.constant 0 : i32
    %2 = arith.cmpi ne, %1, %c0_i32_0 : i32
    scf.if %2 {
      %cst_23 = arith.constant 0.000000e+00 : f32
      %28 = vector.broadcast %cst_23 : f32 to vector<1x128x128xf32>
      %c0_24 = arith.constant 0 : index
      %c0_25 = arith.constant 0 : index
      %c0_26 = arith.constant 0 : index
      %29 = vector.load %arg6[%c0_24, %c0_25, %c0_26] : memref<1x128x128xf32, #tpu.memory_space<vmem>>, vector<1x128x128xf32>
      tpu.vector_store %arg6[%c0_24, %c0_25, %c0_26], %28 {strides = array<i32>} : memref<1x128x128xf32, #tpu.memory_space<vmem>>, vector<1x128x128xf32>,
      %cst_27 = arith.constant 0.000000e+00 : f32
      %30 = vector.broadcast %cst_27 : f32 to vector<1x128x128xf32>
      %c0_28 = arith.constant 0 : index
      %c0_29 = arith.constant 0 : index
      %c0_30 = arith.constant 0 : index
      %31 = vector.load %arg7[%c0_28, %c0_29, %c0_30] : memref<1x128x128xf32, #tpu.memory_space<vmem>>, vector<1x128x128xf32>
      tpu.vector_store %arg7[%c0_28, %c0_29, %c0_30], %30 {strides = array<i32>} : memref<1x128x128xf32, #tpu.memory_space<vmem>>, vector<1x128x128xf32>,
    } else {
    }
    %c0 = arith.constant 0 : index
    %c0_1 = arith.constant 0 : index
    %c0_2 = arith.constant 0 : index
    %3 = vector.load %arg2[%c0, %c0_1, %c0_2] : memref<1x8x128xf32, #tpu.memory_space<vmem>>, vector<1x8x128xf32>
    %4 = vector.shape_cast %3 : vector<1x8x128xf32> to vector<8x128xf32>
    %c0_3 = arith.constant 0 : index
    %c0_4 = arith.constant 0 : index
    %5 = vector.load %arg3[%c0_3, %c0_4] : memref<64x8xf32, #tpu.memory_space<vmem>>, vector<64x8xf32>
    %c0_5 = arith.constant 0 : index
    %c0_6 = arith.constant 0 : index
    %6 = vector.load %arg4[%c0_5, %c0_6] : memref<64x1xf32, #tpu.memory_space<vmem>>, vector<64x1xf32>
    %c0_7 = arith.constant 0 : index
    %c0_8 = arith.constant 0 : index
    %7 = vector.load %arg5[%c0_7, %c0_8] : memref<128x64xf32, #tpu.memory_space<vmem>>, vector<128x64xf32>
    %cst = arith.constant dense<0.000000e+00> : vector<64x128xf32>
    %8 = tpu.matmul %5, %4, %cst {dimension_numbers = #tpu.dot_dimension_numbers<[1], [0], [0], [1], [0, 0, 1, 1], [], []>} : vector<64x8xf32>, vector<8x128xf32>, vector<64x128xf32> -> vector<64x128xf32>
    %9 = vector.broadcast %6 : vector<64x1xf32> to vector<64x128xf32>
    %10 = arith.addf %8, %9 : vector<64x128xf32>
    %cst_9 = arith.constant 2.000000e-01 : f32
    %11 = vector.broadcast %cst_9 : f32 to vector<64x128xf32>
    %12 = arith.mulf %11, %10 : vector<64x128xf32>
    %13 = arith.maximumf %10, %12 : vector<64x128xf32>
    %cst_10 = arith.constant dense<0.000000e+00> : vector<128x128xf32>
    %14 = tpu.matmul %7, %13, %cst_10 {dimension_numbers = #tpu.dot_dimension_numbers<[1], [0], [0], [1], [0, 0, 1, 1], [], []>} : vector<128x64xf32>, vector<64x128xf32>, vector<128x128xf32> -> vector<128x128xf32>
    %15 = arith.mulf %14, %14 : vector<128x128xf32>
    %c0_11 = arith.constant 0 : index
    %c0_12 = arith.constant 0 : index
    %c0_13 = arith.constant 0 : index
    %16 = vector.load %arg6[%c0_11, %c0_12, %c0_13] : memref<1x128x128xf32, #tpu.memory_space<vmem>>, vector<1x128x128xf32>
    %17 = vector.shape_cast %16 : vector<1x128x128xf32> to vector<128x128xf32>
    %18 = arith.addf %17, %14 : vector<128x128xf32>
    %c0_14 = arith.constant 0 : index
    %c0_15 = arith.constant 0 : index
    %c0_16 = arith.constant 0 : index
    %19 = vector.load %arg6[%c0_14, %c0_15, %c0_16] : memref<1x128x128xf32, #tpu.memory_space<vmem>>, vector<1x128x128xf32>
    %20 = vector.shape_cast %19 : vector<1x128x128xf32> to vector<128x128xf32>
    %21 = vector.shape_cast %18 : vector<128x128xf32> to vector<1x128x128xf32>
    tpu.vector_store %arg6[%c0_14, %c0_15, %c0_16], %21 {strides = array<i32>} : memref<1x128x128xf32, #tpu.memory_space<vmem>>, vector<1x128x128xf32>,
    %c0_17 = arith.constant 0 : index
    %c0_18 = arith.constant 0 : index
    %c0_19 = arith.constant 0 : index
    %22 = vector.load %arg7[%c0_17, %c0_18, %c0_19] : memref<1x128x128xf32, #tpu.memory_space<vmem>>, vector<1x128x128xf32>
    %23 = vector.shape_cast %22 : vector<1x128x128xf32> to vector<128x128xf32>
    %24 = arith.addf %23, %15 : vector<128x128xf32>
    %c0_20 = arith.constant 0 : index
    %c0_21 = arith.constant 0 : index
    %c0_22 = arith.constant 0 : index
    %25 = vector.load %arg7[%c0_20, %c0_21, %c0_22] : memref<1x128x128xf32, #tpu.memory_space<vmem>>, vector<1x128x128xf32>
    %26 = vector.shape_cast %25 : vector<1x128x128xf32> to vector<128x128xf32>
    %27 = vector.shape_cast %24 : vector<128x128xf32> to vector<1x128x128xf32>
    tpu.vector_store %arg7[%c0_20, %c0_21, %c0_22], %27 {strides = array<i32>} : memref<1x128x128xf32, #tpu.memory_space<vmem>>, vector<1x128x128xf32>,
    return
  }
  func.func @transform_0(%arg0: i32, %arg1: i32) -> (i32, i32, i32) {
    %c0_i32 = arith.constant 0 : i32
    %c0_i32_0 = arith.constant 0 : i32
    return %arg0, %c0_i32, %arg1 : i32, i32, i32
  }
  func.func @transform_1(%arg0: i32, %arg1: i32) -> (i32, i32) {
    %c0_i32 = arith.constant 0 : i32
    %c0_i32_0 = arith.constant 0 : i32
    %c0_i32_1 = arith.constant 0 : i32
    return %c0_i32, %c0_i32_0 : i32, i32
  }
  func.func @transform_2(%arg0: i32, %arg1: i32) -> (i32, i32) {
    %c0_i32 = arith.constant 0 : i32
    %c0_i32_0 = arith.constant 0 : i32
    %c0_i32_1 = arith.constant 0 : i32
    return %c0_i32, %c0_i32_0 : i32, i32
  }
  func.func @transform_3(%arg0: i32, %arg1: i32) -> (i32, i32) {
    %c0_i32 = arith.constant 0 : i32
    %c0_i32_0 = arith.constant 0 : i32
    %c0_i32_1 = arith.constant 0 : i32
    return %c0_i32, %c0_i32_0 : i32, i32
  }
  func.func @transform_4(%arg0: i32, %arg1: i32) -> (i32, i32, i32) {
    %c0_i32 = arith.constant 0 : i32
    %c0_i32_0 = arith.constant 0 : i32
    %c0_i32_1 = arith.constant 0 : i32
    return %arg0, %c0_i32, %c0_i32_0 : i32, i32, i32
  }
  func.func @transform_5(%arg0: i32, %arg1: i32) -> (i32, i32, i32) {
    %c0_i32 = arith.constant 0 : i32
    %c0_i32_0 = arith.constant 0 : i32
    %c0_i32_1 = arith.constant 0 : i32
    return %arg0, %c0_i32, %c0_i32_0 : i32, i32, i32
  }
}

</mosaic_0001>

<bundles_post_ra>
// kernel: tpu_custom_call.1
= control target key start
LH: loop header
LB: loop body
LE: loop exit
PB: predicated region body
PF: predicated region fallthrough
CT: control target
= control target key end

     0   :  { %s1506_s0 = inlined_call_operand.vmem [shape: f32[2,8,256], index: 0, kind: input, shape index: {}]   ;;  %s1507_s1 = inlined_call_operand.vmem [shape: f32[64,8], index: 1, kind: input, shape index: {}]   ;;  %s1508_s2 = inlined_call_operand.vmem [shape: f32[64,1], index: 2, kind: input, shape index: {}]   ;;  %s1509_s3 = inlined_call_operand.vmem [shape: f32[128,64], index: 3, kind: input, shape index: {}]   ;;  %s1510_s4 = inlined_call_operand.hbm [shape: f32[2,128,128], index: 4, kind: output, shape index: {0}]   ;;  %s1511_s5 = inlined_call_operand.hbm [shape: f32[2,128,128], index: 5, kind: output, shape index: {1}]  }
   0x1   :  { %1512 = sst [smem:[#allocation8_spill]] %s1506_s0 }
   0x2   :  { %1513 = sst [smem:[#allocation9_spill]] %s1507_s1 }
   0x3   :  { %1514 = sst [smem:[#allocation10_spill]] %s1508_s2 }
   0x4   :  { %11 = vsyncpa [#allocation3], 0 }
   0x5   :  { %13 = vsyncpa [#allocation3 + $0x1], 0 }
   0x6   :  { %14 = vsyncpa [#allocation5], 0 }
   0x7   :  { %16 = vsyncpa [#allocation5 + $0x1], 0  ;;  %s1129_s18 = smov 0   ;;  %s1131_s19 = smov 0  }
   0x8   :  { %s1133_s20 = smov 0   ;;  %s1135_s21 = smov 0  }
   0x9   :  { %s1137_s22 = smov 0   ;;  %s1139_s23 = smov 0  }
   0xa   :  { %s1141_s24 = smov 0   ;;  %s1143_s25 = smov 0  }
   0xb LB: > { %s824_s26 = sadd.s32 4294967295, %s1093_s25   ;;  %s825_s27 = sadd.s32 4294967294, %s1093_s25   ;;  %s1093_s25 = sphi %s1143_s25, %s22_s25   ;;  %s1089_s24 = sphi %s1141_s24, %s1526_s24   ;;  %s1085_s23 = sphi %s1139_s23, %s1525_s23   ;;  %s1081_s22 = sphi %s1137_s22, %s1524_s22   ;;  %s1077_s21 = sphi %s1135_s21, %s1523_s21   ;;  %s1073_s20 = sphi %s1133_s20, %s1522_s20   ;;  %s1069_s19 = sphi %s1131_s19, %s1521_s19   ;;  %s1065_s18 = sphi %s1129_s18, %s1520_s18  }
   0xc   : > { %s31_s28 = sadd.s32 1, %s1085_s23  ;;  %s34_s29 = sadd.s32 1, %s1089_s24 }
   0xd   : > { %p32_p0 = scmp.ge.s32.totalorder %s31_s28, 2  ;;  %p142_p1 = scmp.ne.s32.totalorder %s1073_s20, %s1069_s19 }
   0xe   : > { %p143_p2 = scmp.eq.s32.totalorder %s824_s26, 3  ;;  %p148_p4 = scmp.ne.s32.totalorder %s1069_s19, %s1065_s18 }
   0xf   : > { %s1528_s28 = smov (%p32_p0, %s31_s28), 0  ;;  %s1530_s29 = smov (!%p32_p0, %s34_s29), %s1089_s24 }
  0x10   : > { %p1178_p3 = por %p143_p2, %p142_p1  ;;  %p36_p5 = scmp.ge.s32.totalorder %s1530_s29, 2 }
  0x11   : > { %p149_p6 = scmp.eq.s32.totalorder %s825_s27, 3  ;;  %p828_p7 = scmp.ge.s32.totalorder %s1093_s25, 1 }
  0x12   : > { %p213_p8 = scmp.lt.s32.totalorder %s1093_s25, 5  ;;  %s1532_s29 = smov (%p36_p5, %s1530_s29), 0 }
  0x13   : > { %p1188_p9 = por %p149_p6, %p148_p4  ;;  %s129_s7 = ssub.s32 %s1089_s24, %s1532_s29 }
  0x14   : > { %p214_p10 = pnand %p828_p7, %p213_p8  ;;  %s132_s8 = sadd.s32 1, %s1073_s20 }
  0x15   : > { %p130_p11 = scmp.eq.s32.totalorder %s129_s7, 0  ;;  %s1199_s10 = sand.u32 (!%p214_p10), 1, %s1069_s19  }
  0x16   : > { %217 = sbr.rel (%p214_p10) target bundleno = 468 (0x1d4), region = 36  ;;  %p249_p12 = scmp.lt.s32.totalorder (!%p214_p10), %s1081_s22, 1 }
  0x17   : > { %s1196_s9 = scalar_select %p130_p11, %s1073_s20, %s132_s8  }
  0x18   : > { %s829_s11 = sshll.u32 (!%p214_p10), %s1199_s10, 7  ;;  %p251_p13 = scmp.lt.s32.totalorder (!%p214_p10), %s1077_s21, 1 }
  0x19   : > { %s1517_s0 = sld [smem:[#allocation8_spill]] (!%p214_p10)  ;;  %s1211_s7 = scalar_lea.vmem (!%p214_p10), [#allocation2], %s829_s11 }
  0x1a   : > { %s1213_s8 = scalar_lea.vmem (!%p214_p10), [#allocation4], %s829_s11  ;;  %p833_p0 = scmp.ne.s32.totalorder (!%p214_p10), %s1077_s21, 0 }
  0x1b   : > { %s250_s12 = scalar_select %p249_p12, %s1081_s22, 1 }
  0x1c   : > { %s252_s13 = scalar_select %p251_p13, %s1077_s21, 1 }
  0x1d   : > { %s831_s14 = sshll.u32 %s250_s12, 1  ;;  %260 = sbr.rel (%p833_p0) target bundleno = 67 (0x43), region = 40 }
  0x1e   : > { %s254_s15 = sadd.s32 %s831_s14, %s252_s13 }
  0x1f   : > { %s832_s16 = sshll.u32 %s254_s15, 3 }
  0x20   : > { %s1209_s27 = scalar_lea.vmem %s1517_s0, %s832_s16 }
  0x22   : > { %v1095_v0 = vmov 0.0  }
  0x23   : > { %261 = vst [vmem:[%s1211_s7] sm:$0xff] %v1095_v0 }
  0x24   : > { %262 = vst [vmem:[%s1211_s7 + $0x8] sm:$0xff] %v1095_v0 }
  0x25   : > { %263 = vst [vmem:[%s1211_s7 + $0x10] sm:$0xff] %v1095_v0 }
  0x26   : > { %264 = vst [vmem:[%s1211_s7 + $0x18] sm:$0xff] %v1095_v0 }
  0x27   : > { %265 = vst [vmem:[%s1211_s7 + $0x20] sm:$0xff] %v1095_v0 }
  0x28   : > { %266 = vst [vmem:[%s1211_s7 + $0x28] sm:$0xff] %v1095_v0 }
  0x29   : > { %267 = vst [vmem:[%s1211_s7 + $0x30] sm:$0xff] %v1095_v0 }
  0x2a   : > { %268 = vst [vmem:[%s1211_s7 + $0x38] sm:$0xff] %v1095_v0 }
  0x2b   : > { %269 = vst [vmem:[%s1211_s7 + $0x40] sm:$0xff] %v1095_v0 }
  0x2c   : > { %270 = vst [vmem:[%s1211_s7 + $0x48] sm:$0xff] %v1095_v0 }
  0x2d   : > { %271 = vst [vmem:[%s1211_s7 + $0x50] sm:$0xff] %v1095_v0 }
  0x2e   : > { %272 = vst [vmem:[%s1211_s7 + $0x58] sm:$0xff] %v1095_v0 }
  0x2f   : > { %273 = vst [vmem:[%s1211_s7 + $0x60] sm:$0xff] %v1095_v0 }
  0x30   : > { %274 = vst [vmem:[%s1211_s7 + $0x68] sm:$0xff] %v1095_v0 }
  0x31   : > { %275 = vst [vmem:[%s1211_s7 + $0x70] sm:$0xff] %v1095_v0 }
  0x32   : > { %276 = vst [vmem:[%s1211_s7 + $0x78] sm:$0xff] %v1095_v0 }
  0x33   : > { %277 = vst [vmem:[%s1213_s8] sm:$0xff] %v1095_v0 }
  0x34   : > { %278 = vst [vmem:[%s1213_s8 + $0x8] sm:$0xff] %v1095_v0 }
  0x35   : > { %279 = vst [vmem:[%s1213_s8 + $0x10] sm:$0xff] %v1095_v0 }
  0x36   : > { %280 = vst [vmem:[%s1213_s8 + $0x18] sm:$0xff] %v1095_v0 }
  0x37   : > { %281 = vst [vmem:[%s1213_s8 + $0x20] sm:$0xff] %v1095_v0 }
  0x38   : > { %282 = vst [vmem:[%s1213_s8 + $0x28] sm:$0xff] %v1095_v0 }
  0x39   : > { %283 = vst [vmem:[%s1213_s8 + $0x30] sm:$0xff] %v1095_v0 }
  0x3a   : > { %284 = vst [vmem:[%s1213_s8 + $0x38] sm:$0xff] %v1095_v0 }
  0x3b   : > { %285 = vst [vmem:[%s1213_s8 + $0x40] sm:$0xff] %v1095_v0 }
  0x3c   : > { %286 = vst [vmem:[%s1213_s8 + $0x48] sm:$0xff] %v1095_v0 }
  0x3d   : > { %287 = vst [vmem:[%s1213_s8 + $0x50] sm:$0xff] %v1095_v0 }
  0x3e   : > { %288 = vst [vmem:[%s1213_s8 + $0x58] sm:$0xff] %v1095_v0 }
  0x3f   : > { %289 = vst [vmem:[%s1213_s8 + $0x60] sm:$0xff] %v1095_v0 }
  0x40   : > { %290 = vst [vmem:[%s1213_s8 + $0x68] sm:$0xff] %v1095_v0 }
  0x41   : > { %291 = vst [vmem:[%s1213_s8 + $0x70] sm:$0xff] %v1095_v0 }
  0x42   : > { %292 = vst [vmem:[%s1213_s8 + $0x78] sm:$0xff] %v1095_v0 }
  0x43 PF: > { %v293_v1 = vld [vmem:[%s1209_s27] sm:$0xff]  ;;  %s1518_s2 = sld [smem:[#allocation10_spill]]  ;;  %vm366_vm0 = vcmask 64512   ;;  %v1096_v4 = vmov 0   ;;  %v315_v59 = vld [vmem:[%s1509_s3 + $0x28] sm:$0xff]  ;;  %vm448_vm1 = vcmask 523264  }
  0x44   : > { %s1519_s1 = sld [smem:[#allocation9_spill]]  ;;  %965 = vset.pattern.permute.xlu1 %v1096_v4  ;;  %406 = vmatpush.msra.mxu0 %v293_v1  ;;  %v321_v60 = vld [vmem:[%s1509_s3 + $0x58] sm:$0xff]  ;;  %v310_v61 = vld [vmem:[%s1509_s3] sm:$0xff]  ;;  %v316_v62 = vld [vmem:[%s1509_s3 + $0x30] sm:$0xff]  ;;  %s866_s14 = sshll.u32 %s1081_s22, 7 }
  0x45   : > { %964 = vset.pattern.permute.xlu0 %v1096_v4  ;;  %966 = vset.pattern.permute.xlu2 %v1096_v4  ;;  %v322_v63 = vld [vmem:[%s1509_s3 + $0x60] sm:$0xff]  ;;  %v311_v0 = vld [vmem:[%s1509_s3 + $0x8] sm:$0xff]  ;;  %v317_v1 = vld [vmem:[%s1509_s3 + $0x38] sm:$0xff]  ;;  %s691_s17 = scalar_lea.hbm %s1510_s4, %s866_s14  ;;  %s692_s22 = sshll.u32 %s1211_s7, 4  ;;  %s1438_s22 = int_to_ptr.vmem [resolvable:$true] %s692_s22 }
  0x46   : > { %v318_v4 = vld [vmem:[%s1509_s3 + $0x40] sm:$0xff]  ;;  %s694_s26 = sshll.u32 %s691_s17, 4  ;;  %s708_s11 = scalar_lea.hbm %s1511_s5, %s866_s14  ;;  %s1440_s26 = int_to_ptr.hbm [resolvable:$true] %s694_s26 }
  0x47   : > { %s709_s12 = sshll.u32 %s1213_s8, 4  ;;  %s711_s13 = sshll.u32 %s708_s11, 4  ;;  %s1445_s12 = int_to_ptr.vmem [resolvable:$true] %s709_s12  ;;  %s1447_s13 = int_to_ptr.hbm [resolvable:$true] %s711_s13 }
  0x48   : > { %s675_s14 = scalar_lea.sflag [#allocation3], %s1199_s10  ;;  %s981_s15 = sshra.s32 %s1440_s26, 4  ;;  %s982_s15 = int_to_ptr.hbm [resolvable:$true] %s981_s15 }
  0x49   : > { %v307_v2 = vld [vmem:[%s1518_s2 + $0x28] sm:$0xff]  ;;  %v309_v5 = vld [vmem:[%s1518_s2 + $0x38] sm:$0xff]  ;;  %v306_v6 = vld [vmem:[%s1518_s2 + $0x20] sm:$0xff]  ;;  %s983_s16 = scalar_lea.hbm %s982_s15, 128  ;;  %s987_s21 = scalar_lea.hbm %s1510_s4, 256 }
  0x4a   : > { %v294_v3 = vld [vmem:[%s1519_s1] sm:$0xff]  ;;  %353 = vperm.xlu1 %965, %v307_v2   ;;  %363 = vperm.xlu0 %964, %v309_v5   ;;  %v295_v7 = vld [vmem:[%s1519_s1 + $0x8] sm:$0xff]  ;;  %v308_v8 = vld [vmem:[%s1518_s2 + $0x30] sm:$0xff]  ;;  %p984_p1 = scmp.ne.s32.totalorder %s982_s15, %s983_s16  ;;  %p988_p5 = scmp.lt.s32.totalorder %s982_s15, %s1510_s4 }
  0x4b   : > { %834 = vmatmul.msk.f32.vlgmr.msra.gmra.mxu0 %vm366_vm0, %v294_v3  ;;  %v305_v9 = vld [vmem:[%s1518_s2 + $0x18] sm:$0xff]  ;;  %v302_v10 = vld [vmem:[%s1518_s2] sm:$0xff]  ;;  %v296_v11 = vld [vmem:[%s1519_s1 + $0x10] sm:$0xff]  ;;  %p989_p6 = scmp.lt.s32.totalorder %s987_s21, %s983_s16 }
  0x4c   : > { %343 = vperm.xlu2 %966, %v305_v9   ;;  %v303_v12 = vld [vmem:[%s1518_s2 + $0x8] sm:$0xff]  ;;  %v304_v13 = vld [vmem:[%s1518_s2 + $0x10] sm:$0xff]  ;;  %v297_v14 = vld [vmem:[%s1519_s1 + $0x18] sm:$0xff]  ;;  %p985_p2 = pnand %p984_p1, %p1178_p3 }
  0x4d   : > { %v298_v15 = vld [vmem:[%s1519_s1 + $0x20] sm:$0xff]  ;;  %v299_v16 = vld [vmem:[%s1519_s1 + $0x28] sm:$0xff]  ;;  %v300_v17 = vld [vmem:[%s1519_s1 + $0x30] sm:$0xff]  ;;  %p990_p7 = por %p989_p6, %p988_p5 }
  0x4e   : > { %v301_v18 = vld [vmem:[%s1519_s1 + $0x38] sm:$0xff]  ;;  %v323_v2 = vld [vmem:[%s1509_s3 + $0x68] sm:$0xff]  ;;  %v312_v3 = vld [vmem:[%s1509_s3 + $0x10] sm:$0xff]  ;;  %p986_p4 = pneg %p985_p2 }
  0x4f   : > { %v324_v5 = vld [vmem:[%s1509_s3 + $0x70] sm:$0xff]  ;;  %v314_v9 = vld [vmem:[%s1509_s3 + $0x20] sm:$0xff] }
  0x50   : > { %p991_p8 = pnand %p990_p7, %p986_p4 }
  0x52   : > { %348 = vperm.xlu1 %965, %v306_v6   ;;  %358 = vperm.xlu0 %964, %v308_v8   ;;  %v313_v6 = vld [vmem:[%s1509_s3 + $0x18] sm:$0xff] }
  0x53   : > { %835 = vmatmul.msk.f32.gmra.mxu0 %vm366_vm0, %v295_v7  ;;  %v319_v7 = vld [vmem:[%s1509_s3 + $0x48] sm:$0xff]  ;;  %v325_v8 = vld [vmem:[%s1509_s3 + $0x78] sm:$0xff] }
  0x54   : > { %338 = vperm.xlu2 %966, %v304_v13   ;;  %v626_v13 = vld [vmem:[%s1213_s8] sm:$0xff] }
  0x5a   : > { %328 = vperm.xlu1 %965, %v302_v10   ;;  %333 = vperm.xlu0 %964, %v303_v12   ;;  %v320_v10 = vld [vmem:[%s1509_s3 + $0x50] sm:$0xff] }
  0x5b   : > { %836 = vmatmul.msk.f32.gmra.mxu0 %vm366_vm0, %v296_v11  ;;  %v578_v11 = vld [vmem:[%s1211_s7] sm:$0xff] }
  0x63   : > { %837 = vmatmul.msk.f32.gmra.mxu0 %vm366_vm0, %v297_v14 }
  0x6b   : > { %838 = vmatmul.msk.f32.gmra.mxu0 %vm366_vm0, %v298_v15 }
  0x73   : > { %839 = vmatmul.msk.f32.gmra.mxu0 %vm366_vm0, %v299_v16  ;;  %v583_v16 = vld [vmem:[%s1211_s7 + $0x28] sm:$0xff] }
  0x7b   : > { %840 = vmatmul.msk.f32.gmra.mxu0 %vm366_vm0, %v300_v17 }
  0x83   : > { %841 = vmatmul.msk.f32.gmra.mxu0 %vm366_vm0, %v301_v18  ;;  %v589_v18 = vld [vmem:[%s1211_s7 + $0x58] sm:$0xff] }
  0xa6   : > { %v344_v28 = vpop.permute.xlu2 %343 }
  0xae   : > { %v339_v38 = vpop.permute.xlu2 %338 }
  0xbc   : > { %v364_v25 = vpop.permute.xlu0 %363  ;;  %v354_v26 = vpop.permute.xlu1 %353 }
  0xc4   : > { %v359_v29 = vpop.permute.xlu0 %358  ;;  %v349_v30 = vpop.permute.xlu1 %348 }
  0xc8   : > { %v408_v19 = vpop.f32.mrf.mxu0 }
  0xcc   : > { %v334_v42 = vpop.permute.xlu0 %333  ;;  %v329_v46 = vpop.permute.xlu1 %328 }
  0xcd   : > { %v409_v50 = vadd.f32 %v408_v19, %v329_v46 }
  0xcf   : > { %v432_v55 = vmul.f32 0.2, %v409_v50 }
  0xd0   : > { %v411_v20 = vpop.f32.mrf.mxu0 }
  0xd1   : > { %v412_v47 = vadd.f32 %v411_v20, %v334_v42  ;;  %v440_v58 = vmax.f32 %v409_v50, %v432_v55  ;;  %v631_v20 = vld [vmem:[%s1213_s8 + $0x28] sm:$0xff]  ;;  %v638_v42 = vld [vmem:[%s1213_s8 + $0x60] sm:$0xff] }
  0xd3   : > { %v433_v53 = vmul.f32 0.2, %v412_v47 }
  0xd5   : > { %v441_v57 = vmax.f32 %v412_v47, %v433_v53 }
  0xd8   : > { %v414_v21 = vpop.f32.mrf.mxu0 }
  0xd9   : > { %v415_v43 = vadd.f32 %v414_v21, %v339_v38  ;;  %v632_v38 = vld [vmem:[%s1213_s8 + $0x30] sm:$0xff] }
  0xdb   : > { %v434_v51 = vmul.f32 0.2, %v415_v43 }
  0xdd   : > { %v442_v56 = vmax.f32 %v415_v43, %v434_v51  ;;  %v580_v43 = vld [vmem:[%s1211_s7 + $0x10] sm:$0xff] }
  0xe0   : > { %v417_v22 = vpop.f32.mrf.mxu0 }
  0xe1   : > { %v418_v39 = vadd.f32 %v417_v22, %v344_v28 }
  0xe3   : > { %v435_v48 = vmul.f32 0.2, %v418_v39 }
  0xe5   : > { %v443_v54 = vmax.f32 %v418_v39, %v435_v48  ;;  %v628_v48 = vld [vmem:[%s1213_s8 + $0x10] sm:$0xff] }
  0xe8   : > { %v420_v23 = vpop.f32.mrf.mxu0 }
  0xe9   : > { %v421_v35 = vadd.f32 %v420_v23, %v349_v30  ;;  %v627_v30 = vld [vmem:[%s1213_s8 + $0x8] sm:$0xff] }
  0xeb   : > { %v436_v44 = vmul.f32 0.2, %v421_v35 }
  0xed   : > { %v444_v52 = vmax.f32 %v421_v35, %v436_v44 }
  0xf0   : > { %v423_v24 = vpop.f32.mrf.mxu0 }
  0xf1   : > { %v424_v33 = vadd.f32 %v423_v24, %v354_v26  ;;  %v637_v24 = vld [vmem:[%s1213_s8 + $0x58] sm:$0xff] }
  0xf3   : > { %v437_v40 = vmul.f32 0.2, %v424_v33 }
  0xf5   : > { %v445_v49 = vmax.f32 %v424_v33, %v437_v40 }
  0xf8   : > { %v426_v27 = vpop.f32.mrf.mxu0 }
  0xf9   : > { %v427_v31 = vadd.f32 %v426_v27, %v359_v29 }
  0xfb   : > { %v438_v36 = vmul.f32 0.2, %v427_v31 }
  0xfd   : > { %v446_v45 = vmax.f32 %v427_v31, %v438_v36  ;;  %v590_v36 = vld [vmem:[%s1211_s7 + $0x60] sm:$0xff] }
 0x100   : > { %v429_v32 = vpop.f32.mrf.mxu0 }
 0x101   : > { %v430_v34 = vadd.f32 %v429_v32, %v364_v25  ;;  %v579_v25 = vld [vmem:[%s1211_s7 + $0x8] sm:$0xff] }
 0x103   : > { %v439_v37 = vmul.f32 0.2, %v430_v34 }
 0x105   : > { %v447_v41 = vmax.f32 %v430_v34, %v439_v37  ;;  %v584_v34 = vld [vmem:[%s1211_s7 + $0x30] sm:$0xff] }
 0x107   : > { %505 = vmatpush.msra.mxu1 %v447_v41  ;;  %868 = vmatpush.msra.mxu2 %v447_v41 }
 0x108   : > { %869 = vmatpush.msra.mxu3 %v447_v41 }
 0x109   : > { %506 = vmatpush.msra.mxu1 %v446_v45  ;;  %870 = vmatpush.msra.mxu2 %v446_v45 }
 0x10a   : > { %871 = vmatpush.msra.mxu3 %v446_v45 }
 0x10b   : > { %507 = vmatpush.msra.mxu1 %v445_v49  ;;  %872 = vmatpush.msra.mxu2 %v445_v49 }
 0x10c   : > { %873 = vmatpush.msra.mxu3 %v445_v49 }
 0x10d   : > { %508 = vmatpush.msra.mxu1 %v444_v52  ;;  %874 = vmatpush.msra.mxu2 %v444_v52 }
 0x10e   : > { %875 = vmatpush.msra.mxu3 %v444_v52  ;;  %v585_v52 = vld [vmem:[%s1211_s7 + $0x38] sm:$0xff] }
 0x10f   : > { %509 = vmatpush.msra.mxu1 %v443_v54  ;;  %876 = vmatpush.msra.mxu2 %v443_v54 }
 0x110   : > { %877 = vmatpush.msra.mxu3 %v443_v54  ;;  %v591_v54 = vld [vmem:[%s1211_s7 + $0x68] sm:$0xff] }
 0x111   : > { %510 = vmatpush.msra.mxu1 %v442_v56  ;;  %878 = vmatpush.msra.mxu2 %v442_v56 }
 0x112   : > { %879 = vmatpush.msra.mxu3 %v442_v56  ;;  %v633_v56 = vld [vmem:[%s1213_s8 + $0x38] sm:$0xff] }
 0x113   : > { %511 = vmatpush.msra.mxu1 %v441_v57  ;;  %880 = vmatpush.msra.mxu2 %v441_v57 }
 0x114   : > { %881 = vmatpush.msra.mxu3 %v441_v57 }
 0x115   : > { %512 = vmatpush.msra.mxu1 %v440_v58  ;;  %882 = vmatpush.msra.mxu2 %v440_v58 }
 0x116   : > { %883 = vmatpush.msra.mxu3 %v440_v58  ;;  %847 = vmatmul.msk.f32.vlgmr.msra.gmra.mxu2 %vm448_vm1, %v315_v59 }
 0x117   : > { %853 = vmatmul.msk.f32.vlgmr.msra.gmra.mxu3 %vm448_vm1, %v321_v60  ;;  %842 = vmatmul.msk.f32.vlgmr.msra.gmra.mxu1 %vm448_vm1, %v310_v61  ;;  %v639_v60 = vld [vmem:[%s1213_s8 + $0x68] sm:$0xff]  ;;  %v581_v61 = vld [vmem:[%s1211_s7 + $0x18] sm:$0xff] }
 0x11e   : > { %848 = vmatmul.msk.f32.gmra.mxu2 %vm448_vm1, %v316_v62 }
 0x11f   : > { %854 = vmatmul.msk.f32.gmra.mxu3 %vm448_vm1, %v322_v63  ;;  %843 = vmatmul.msk.f32.gmra.mxu1 %vm448_vm1, %v311_v0 }
 0x126   : > { %849 = vmatmul.msk.f32.gmra.mxu2 %vm448_vm1, %v317_v1 }
 0x127   : > { %855 = vmatmul.msk.f32.gmra.mxu3 %vm448_vm1, %v323_v2  ;;  %844 = vmatmul.msk.f32.gmra.mxu1 %vm448_vm1, %v312_v3  ;;  %v629_v2 = vld [vmem:[%s1213_s8 + $0x18] sm:$0xff] }
 0x12e   : > { %850 = vmatmul.msk.f32.gmra.mxu2 %vm448_vm1, %v318_v4 }
 0x12f   : > { %856 = vmatmul.msk.f32.gmra.mxu3 %vm448_vm1, %v324_v5  ;;  %845 = vmatmul.msk.f32.gmra.mxu1 %vm448_vm1, %v313_v6  ;;  %v586_v6 = vld [vmem:[%s1211_s7 + $0x40] sm:$0xff] }
 0x136   : > { %851 = vmatmul.msk.f32.gmra.mxu2 %vm448_vm1, %v319_v7 }
 0x137   : > { %857 = vmatmul.msk.f32.gmra.mxu3 %vm448_vm1, %v325_v8  ;;  %846 = vmatmul.msk.f32.gmra.mxu1 %vm448_vm1, %v314_v9  ;;  %v592_v8 = vld [vmem:[%s1211_s7 + $0x70] sm:$0xff] }
 0x13e   : > { %852 = vmatmul.msk.f32.gmra.mxu2 %vm448_vm1, %v320_v10  ;;  %v634_v10 = vld [vmem:[%s1213_s8 + $0x40] sm:$0xff] }
 0x194   : > { %v514_v12 = vpop.f32.mrf.mxu1 }
 0x195   : > { %v562_v14 = vmul.f32 %v514_v12, %v514_v12  ;;  %v594_v15 = vadd.f32 %v578_v11, %v514_v12 }
 0x197   : > { %610 = vst [vmem:[%s1211_s7] sm:$0xff] %v594_v15  ;;  %v642_v17 = vadd.f32 %v626_v13, %v562_v14  ;;  %v640_v14 = vld [vmem:[%s1213_s8 + $0x70] sm:$0xff]  ;;  %v582_v15 = vld [vmem:[%s1211_s7 + $0x20] sm:$0xff] }
 0x199   : > { %v529_v19 = vpop.f32.mrf.mxu2  ;;  %658 = vst [vmem:[%s1213_s8] sm:$0xff] %v642_v17 }
 0x19a   : > { %v567_v21 = vmul.f32 %v529_v19, %v529_v19  ;;  %v599_v22 = vadd.f32 %v583_v16, %v529_v19  ;;  %v547_v23 = vpop.f32.mrf.mxu3 }
 0x19b   : > { %v573_v26 = vmul.f32 %v547_v23, %v547_v23  ;;  %v605_v27 = vadd.f32 %v589_v18, %v547_v23 }
 0x19c   : > { %615 = vst [vmem:[%s1211_s7 + $0x28] sm:$0xff] %v599_v22  ;;  %v647_v28 = vadd.f32 %v631_v20, %v567_v21  ;;  %v517_v29 = vpop.f32.mrf.mxu1  ;;  %v630_v20 = vld [vmem:[%s1213_s8 + $0x20] sm:$0xff] }
 0x19d   : > { %621 = vst [vmem:[%s1211_s7 + $0x58] sm:$0xff] %v605_v27  ;;  %v653_v31 = vadd.f32 %v637_v24, %v573_v26  ;;  %v563_v32 = vmul.f32 %v517_v29, %v517_v29  ;;  %v595_v33 = vadd.f32 %v579_v25, %v517_v29  ;;  %v587_v24 = vld [vmem:[%s1211_s7 + $0x48] sm:$0xff]  ;;  %v593_v26 = vld [vmem:[%s1211_s7 + $0x78] sm:$0xff] }
 0x19e   : > { %663 = vst [vmem:[%s1213_s8 + $0x28] sm:$0xff] %v647_v28  ;;  %v635_v28 = vld [vmem:[%s1213_s8 + $0x48] sm:$0xff] }
 0x19f   : > { %669 = vst [vmem:[%s1213_s8 + $0x58] sm:$0xff] %v653_v31  ;;  %v643_v35 = vadd.f32 %v627_v30, %v563_v32  ;;  %v641_v32 = vld [vmem:[%s1213_s8 + $0x78] sm:$0xff] }
 0x1a0   : > { %611 = vst [vmem:[%s1211_s7 + $0x8] sm:$0xff] %v595_v33 }
 0x1a1   : > { %v532_v37 = vpop.f32.mrf.mxu2  ;;  %659 = vst [vmem:[%s1213_s8 + $0x8] sm:$0xff] %v643_v35 }
 0x1a2   : > { %v568_v39 = vmul.f32 %v532_v37, %v532_v37  ;;  %v600_v40 = vadd.f32 %v584_v34, %v532_v37  ;;  %v550_v41 = vpop.f32.mrf.mxu3  ;;  %v588_v37 = vld [vmem:[%s1211_s7 + $0x50] sm:$0xff] }
 0x1a3   : > { %v574_v44 = vmul.f32 %v550_v41, %v550_v41  ;;  %v606_v45 = vadd.f32 %v590_v36, %v550_v41 }
 0x1a4   : > { %616 = vst [vmem:[%s1211_s7 + $0x30] sm:$0xff] %v600_v40  ;;  %v648_v46 = vadd.f32 %v632_v38, %v568_v39  ;;  %v520_v47 = vpop.f32.mrf.mxu1  ;;  %v636_v39 = vld [vmem:[%s1213_s8 + $0x50] sm:$0xff] }
 0x1a5   : > { %622 = vst [vmem:[%s1211_s7 + $0x60] sm:$0xff] %v606_v45  ;;  %v654_v49 = vadd.f32 %v638_v42, %v574_v44  ;;  %v564_v50 = vmul.f32 %v520_v47, %v520_v47  ;;  %v596_v51 = vadd.f32 %v580_v43, %v520_v47 }
 0x1a6   : > { %664 = vst [vmem:[%s1213_s8 + $0x30] sm:$0xff] %v648_v46 }
 0x1a7   : > { %670 = vst [vmem:[%s1213_s8 + $0x60] sm:$0xff] %v654_v49  ;;  %v644_v53 = vadd.f32 %v628_v48, %v564_v50 }
 0x1a8   : > { %612 = vst [vmem:[%s1211_s7 + $0x10] sm:$0xff] %v596_v51 }
 0x1a9   : > { %v535_v55 = vpop.f32.mrf.mxu2  ;;  %660 = vst [vmem:[%s1213_s8 + $0x10] sm:$0xff] %v644_v53 }
 0x1aa   : > { %v569_v57 = vmul.f32 %v535_v55, %v535_v55  ;;  %v601_v58 = vadd.f32 %v585_v52, %v535_v55  ;;  %v553_v59 = vpop.f32.mrf.mxu3 }
 0x1ab   : > { %v575_v62 = vmul.f32 %v553_v59, %v553_v59  ;;  %v607_v63 = vadd.f32 %v591_v54, %v553_v59 }
 0x1ac   : > { %617 = vst [vmem:[%s1211_s7 + $0x38] sm:$0xff] %v601_v58  ;;  %v649_v0 = vadd.f32 %v633_v56, %v569_v57  ;;  %v523_v1 = vpop.f32.mrf.mxu1 }
 0x1ad   : > { %623 = vst [vmem:[%s1211_s7 + $0x68] sm:$0xff] %v607_v63  ;;  %v655_v3 = vadd.f32 %v639_v60, %v575_v62  ;;  %v565_v4 = vmul.f32 %v523_v1, %v523_v1  ;;  %v597_v5 = vadd.f32 %v581_v61, %v523_v1 }
 0x1ae   : > { %665 = vst [vmem:[%s1213_s8 + $0x38] sm:$0xff] %v649_v0 }
 0x1af   : > { %671 = vst [vmem:[%s1213_s8 + $0x68] sm:$0xff] %v655_v3  ;;  %v645_v7 = vadd.f32 %v629_v2, %v565_v4 }
 0x1b0   : > { %613 = vst [vmem:[%s1211_s7 + $0x18] sm:$0xff] %v597_v5 }
 0x1b1   : > { %v538_v9 = vpop.f32.mrf.mxu2  ;;  %661 = vst [vmem:[%s1213_s8 + $0x18] sm:$0xff] %v645_v7 }
 0x1b2   : > { %v570_v11 = vmul.f32 %v538_v9, %v538_v9  ;;  %v602_v12 = vadd.f32 %v586_v6, %v538_v9  ;;  %v556_v13 = vpop.f32.mrf.mxu3 }
 0x1b3   : > { %v576_v16 = vmul.f32 %v556_v13, %v556_v13  ;;  %v608_v17 = vadd.f32 %v592_v8, %v556_v13 }
 0x1b4   : > { %618 = vst [vmem:[%s1211_s7 + $0x40] sm:$0xff] %v602_v12  ;;  %v650_v18 = vadd.f32 %v634_v10, %v570_v11  ;;  %v526_v19 = vpop.f32.mrf.mxu1 }
 0x1b5   : > { %624 = vst [vmem:[%s1211_s7 + $0x70] sm:$0xff] %v608_v17  ;;  %v656_v21 = vadd.f32 %v640_v14, %v576_v16  ;;  %v566_v22 = vmul.f32 %v526_v19, %v526_v19  ;;  %v598_v23 = vadd.f32 %v582_v15, %v526_v19 }
 0x1b6   : > { %666 = vst [vmem:[%s1213_s8 + $0x40] sm:$0xff] %v650_v18 }
 0x1b7   : > { %672 = vst [vmem:[%s1213_s8 + $0x70] sm:$0xff] %v656_v21  ;;  %v646_v25 = vadd.f32 %v630_v20, %v566_v22 }
 0x1b8   : > { %614 = vst [vmem:[%s1211_s7 + $0x20] sm:$0xff] %v598_v23 }
 0x1b9   : > { %v541_v27 = vpop.f32.mrf.mxu2  ;;  %662 = vst [vmem:[%s1213_s8 + $0x20] sm:$0xff] %v646_v25 }
 0x1ba   : > { %v571_v29 = vmul.f32 %v541_v27, %v541_v27  ;;  %v603_v30 = vadd.f32 %v587_v24, %v541_v27  ;;  %v559_v31 = vpop.f32.mrf.mxu3 }
 0x1bb   : > { %v577_v33 = vmul.f32 %v559_v31, %v559_v31  ;;  %v609_v34 = vadd.f32 %v593_v26, %v559_v31 }
 0x1bc   : > { %619 = vst [vmem:[%s1211_s7 + $0x48] sm:$0xff] %v603_v30  ;;  %v651_v35 = vadd.f32 %v635_v28, %v571_v29 }
 0x1bd   : > { %625 = vst [vmem:[%s1211_s7 + $0x78] sm:$0xff] %v609_v34  ;;  %v657_v36 = vadd.f32 %v641_v32, %v577_v33 }
 0x1be   : > { %667 = vst [vmem:[%s1213_s8 + $0x48] sm:$0xff] %v651_v35 }
 0x1bf   : > { %673 = vst [vmem:[%s1213_s8 + $0x78] sm:$0xff] %v657_v36 }
 0x1c1   : > { %v544_v38 = vpop.f32.mrf.mxu2 }
 0x1c2   : > { %v572_v40 = vmul.f32 %v544_v38, %v544_v38  ;;  %v604_v41 = vadd.f32 %v588_v37, %v544_v38 }
 0x1c4   : > { %620 = vst [vmem:[%s1211_s7 + $0x50] sm:$0xff] %v604_v41  ;;  %v652_v42 = vadd.f32 %v636_v39, %v572_v40 }
 0x1c5   : > { %994 = shalt.err (!%p991_p8)
}
 0x1c6   : > { %s1097_s7 = smov 128   ;;  %s1098_s1 = smov 8   ;;  %668 = vst [vmem:[%s1213_s8 + $0x50] sm:$0xff] %v652_v42 }
 0x1c7   : > { %884 = dma.vmem_to_hbm [thread:$0]  (%p1178_p3), %s1438_s22, 2048, %s1440_s26, %s675_s14, %s1097_s7, %s1097_s7, %s1098_s1  }
 0x1c8   : > { %s680_s17 = scalar_lea.sflag [#allocation5], %s1199_s10  ;;  %s1009_s27 = sshra.s32 %s1447_s13, 4  ;;  %s1010_s27 = int_to_ptr.hbm [resolvable:$true] %s1009_s27 }
 0x1c9   : > { %s1011_s0 = scalar_lea.hbm %s1010_s27, 128  ;;  %s1015_s21 = scalar_lea.hbm %s1511_s5, 256 }
 0x1ca   : > { %p1012_p10 = scmp.ne.s32.totalorder %s1010_s27, %s1011_s0  ;;  %p1016_p13 = scmp.lt.s32.totalorder %s1010_s27, %s1511_s5 }
 0x1cb   : > { %p1017_p0 = scmp.lt.s32.totalorder %s1015_s21, %s1011_s0 }
 0x1cc   : > { %p1013_p11 = pnand %p1012_p10, %p1178_p3 }
 0x1cd   : > { %p1018_p1 = por %p1017_p0, %p1016_p13 }
 0x1ce   : > { %p1014_p12 = pneg %p1013_p11 }
 0x1d0   : > { %p1019_p2 = pnand %p1018_p1, %p1014_p12 }
 0x1d2   : > { %1022 = shalt.err (!%p1019_p2)
}
 0x1d3   : > { %885 = dma.vmem_to_hbm [thread:$0]  (%p1178_p3), %s1445_s12, 2048, %s1447_s13, %s680_s17, %s1097_s7, %s1097_s7, %s1098_s1  }
 0x1d4 PF: > { %p895_p4 = scmp.ge.s32.totalorder %s1093_s25, 2  ;;  %s726_s10 = sand.u32 1, %s1065_s18  }
 0x1d5   : > { %s727_s2 = scalar_lea.sflag [#allocation3], %s726_s10 }
 0x1d6   : > { %p889_p5 = pnand %p895_p4, %p1188_p9 }
 0x1d8   : > { %p890_p6 = pneg %p889_p5 }
 0x1da   : > { %1056 = dma.done.wait (%p890_p6), %s727_s2, 2048  }
 0x1db   : > { %1058 = vsyncadd (%p890_p6), %s727_s2, 4294965248  ;;  %s737_s8 = scalar_lea.sflag [#allocation5], %s726_s10 }
 0x1dc   : > { %1060 = dma.done.wait (%p890_p6), %s737_s8, 2048  }
 0x1dd   : > { %1062 = vsyncadd (%p890_p6), %s737_s8, 4294965248  ;;  %s22_s25 = sadd.s32 1, %s1093_s25   ;;  %s1520_s18 = smov %s1069_s19 }
 0x1de   : > { %p19_p7 = scmp.ge.s32.totalorder %s22_s25, 6   ;;  %s1521_s19 = smov %s1073_s20 }
 0x1df   : > { %s1522_s20 = smov %s1196_s9  ;;  %s1523_s21 = smov %s1085_s23 }
 0x1e0   : > { %s1524_s22 = smov %s1089_s24  ;;  %s1525_s23 = smov %s1528_s28 }
 0x1e1   : > { %s1526_s24 = smov %s1532_s29  ;;  %21 = sbr.rel (!%p19_p7) target bundleno = 11 (0xb), region = 92 }
 0x1e6   :  { %743 = vsyncpa [#allocation3], 1 }
 0x1e7   :  { %745 = vsyncpa [#allocation3 + $0x1], 1 }
 0x1e8   :  { %746 = vsyncpa [#allocation5], 1 }
 0x1e9   :  { %748 = vsyncpa [#allocation5 + $0x1], 1 }

</bundles_post_ra>
